<compile_context>
chip_gen: v7x
topology: tpu7x:2x2x1
jax: 0.10.0
libtpu: 0.0.40
codegen_flags: <defaults>
</compile_context>

<pallas_src>
import jax
import jax.numpy as jnp
from jax.experimental import pallas as pl
from jax.experimental.pallas import tpu as pltpu

PRIMITIVES = ("add", "mul", "l1", "l2")  # synthetic primitive set (see TODO above)

_PRIM_FNS = {
    "add": lambda a, b: a + b,
    "mul": lambda a, b: a * b,
    "l1":  lambda a, b: jnp.abs(a - b),
    "l2":  lambda a, b: (a - b) * (a - b),
}

_MAX_LANES = 2048               # lane-dense slab width cap (multiple of 128)
_TARGET_BLOCK_BYTES = 2 << 20   # ~2 MiB per input block (double-buffered -> ~12 MiB VMEM)
_FAST_PATH_BYTES = 2 << 20      # below this, fused XLA beats pallas_call launch overhead
_VMEM_LIMIT_BYTES = 32 << 20    # safe on v5e (128 MiB phys), v6e (128), v7x (64 per TC)


def _mixed_op_kernel(sel_ref, x1_ref, x2_ref, o_ref):
    """Selected primitive, scaled by its weight.

    sel_ref        : SMEM scalar-prefetch ref, shape (2,) f32 = [idx_as_f32, weight]
    x1_ref, x2_ref : VMEM tiles (TM, LANES)
    o_ref          : VMEM tile  (TM, LANES)
    """
    # idx is a small exact integer stored in f32 (packed with w into one SMEM
    # array to avoid a second tiny prefetch DMA); compare in f32 directly.
    idx = sel_ref[0]
    # Cast w to the compute/output dtype so bf16/f16 inputs stay in bf16 on
    # the VPU (v6e/v7x); on v5e the compiler promotes internally.
    w = sel_ref[1].astype(o_ref.dtype)
    a = x1_ref[...]
    b = x2_ref[...]

    # One pl.when per primitive (phase-gated on the SMEM scalar): only the
    # selected primitive is emitted, no vselects, minimal live vregs.
    for k, name in enumerate(PRIMITIVES):
        fn = _PRIM_FNS[name]

        @pl.when(idx == jnp.float32(k))
        def _(fn=fn):
            o_ref[...] = (fn(a, b) * w).astype(o_ref.dtype)


def _sublane_multiple(dtype):
    # sublane packing multiple: 8 rows for 4-byte, 16 for 2-byte, 32 for 1-byte dtypes
    return {4: 8, 2: 16, 1: 32}.get(jnp.dtype(dtype).itemsize, 8)


def _pick_lanes(total, cap=_MAX_LANES):
    """Largest multiple of 128 that divides `total` (<= cap), or None."""
    if total <= 0 or total % 128 != 0:
        return None
    m = total // 128
    for d in range(min(cap // 128, m), 0, -1):
        if m % d == 0:
            return d * 128
    return None


def _mixed_op_jax(x1, x2, idx, w):
    """Plain-JAX fast path (same selection semantics, idx is traced)."""
    branches = tuple(_PRIM_FNS[name] for name in PRIMITIVES)
    res = jax.lax.switch(idx, branches, x1, x2)
    return (w.astype(x1.dtype) * res).astype(x1.dtype)


def mixed_op(x1, x2, ops_weights, gumbel_training=True, force_pallas=False):
    """JAX/Pallas equivalent of MixedOp.forward(x1, x2, ops_weights)."""
    assert x1.shape == x2.shape
    assert x1.dtype == x2.dtype

    # --- selection glue (scalar work, plain JAX) --------------------------
    idx = jnp.argmax(ops_weights, axis=-1).astype(jnp.int32)
    if gumbel_training:
        w = ops_weights[idx].astype(jnp.float32)
    else:
        w = jnp.ones((), jnp.float32)

    itemsize = jnp.dtype(x1.dtype).itemsize
    total = x1.size
    total_bytes = total * itemsize

    lanes = _pick_lanes(total)

    # --- fast / fallback path ---------------------------------------------
    # Tiny tensors: pallas_call launch + pipeline prologue dominates.
    # Non-128-divisible element counts: padding would require materializing
    # copies of both inputs + slicing the output (~2x HBM traffic), so the
    # fused XLA expression wins there too.
    small = (not force_pallas) and total_bytes < _FAST_PATH_BYTES
    if small or lanes is None:
        return _mixed_op_jax(x1, x2, idx, w)

    # --- copy-free reshape to a lane-dense (rows, lanes) slab --------------
    orig_shape = x1.shape
    rows = total // lanes
    sub = _sublane_multiple(x1.dtype)

    # ~2 MiB per input block, rounded down to the sublane packing multiple.
    target_rows = max(sub, (_TARGET_BLOCK_BYTES // (lanes * itemsize)) // sub * sub)
    tm = target_rows
    # Keep >=4 grid steps on mid-size tensors so DMA of block i+1 overlaps
    # compute + writeback of block i.
    quarter = (rows // 4) // sub * sub
    if quarter >= sub:
        tm = min(tm, quarter)
    if tm >= rows:
        tm = rows          # single block; full-extent row dim is always legal
    num_blocks = pl.cdiv(rows, tm)   # last block may be partial (tm % sub == 0)

    x1f = x1.reshape(rows, lanes)
    x2f = x2.reshape(rows, lanes)

    # Pack (idx, w) into one (2,) f32 SMEM prefetch array (single tiny DMA).
    sel = jnp.stack([idx.astype(jnp.float32), w])

    blk = pl.BlockSpec((tm, lanes), lambda i, sel_ref: (i, 0))
    out = pl.pallas_call(
        _mixed_op_kernel,
        out_shape=jax.ShapeDtypeStruct((rows, lanes), x1.dtype),
        grid_spec=pltpu.PrefetchScalarGridSpec(
            num_scalar_prefetch=1,            # packed [idx, w] -> SMEM
            grid=(num_blocks,),
            in_specs=[blk, blk],
            out_specs=blk,
        ),
        compiler_params=pltpu.CompilerParams(
            dimension_semantics=("parallel",),      # megacore split on v7x
            vmem_limit_bytes=_VMEM_LIMIT_BYTES),
    )(sel, x1f, x2f)

    return out.reshape(orig_shape)   # copy-free (row-major contiguous)


def _reference(x1, x2, ops_weights, gumbel_training=True):
    """Pure-JAX reference of the same semantics (for sanity checks)."""
    idx = int(jnp.argmax(ops_weights, axis=-1))
    r = _PRIM_FNS[PRIMITIVES[idx]](x1, x2)
    w = jnp.float32(ops_weights[idx]) if gumbel_training else jnp.float32(1.0)
    return (w * r).astype(x1.dtype)


if __name__ == "__main__":
    key = jax.random.PRNGKey(0)
    k1, k2, k3 = jax.random.split(key, 3)

    ops_weights = jax.nn.softmax(
        jax.random.normal(k3, (len(PRIMITIVES),), dtype=jnp.float32))

    # 1) small NCHW shape consistent with the forward (fast path): B=2, C=4, H=W=16
    x1 = jax.random.normal(k1, (2, 4, 16, 16), dtype=jnp.float32)
    x2 = jax.random.normal(k2, (2, 4, 16, 16), dtype=jnp.float32)
    out = mixed_op(x1, x2, ops_weights, gumbel_training=True)
    jax.block_until_ready(out)
    ref = _reference(x1, x2, ops_weights, gumbel_training=True)
    assert out.shape == x1.shape
    assert jnp.allclose(out, ref, atol=1e-5, rtol=1e-5)

    # 2) same small shape forced through the Pallas kernel (rows=1, grid=1)
    out_p = mixed_op(x1, x2, ops_weights, gumbel_training=True, force_pallas=True)
    jax.block_until_ready(out_p)
    assert jnp.allclose(out_p, ref, atol=1e-5, rtol=1e-5)

    # 3) non-gumbel path (unit weight) through the Pallas kernel
    out_ng = mixed_op(x1, x2, ops_weights, gumbel_training=False, force_pallas=True)
    jax.block_until_ready(out_ng)
    ref_ng = _reference(x1, x2, ops_weights, gumbel_training=False)
    assert jnp.allclose(out_ng, ref_ng, atol=1e-5, rtol=1e-5)

    # 4) larger input -> multi-step grid (rows=256, tm=64, grid=4), no pad/slice
    xb1 = jax.random.normal(k1, (4, 8, 128, 128), dtype=jnp.float32)
    xb2 = jax.random.normal(k2, (4, 8, 128, 128), dtype=jnp.float32)
    out_b = mixed_op(xb1, xb2, ops_weights, gumbel_training=True)
    jax.block_until_ready(out_b)
    ref_b = _reference(xb1, xb2, ops_weights, gumbel_training=True)
    assert jnp.allclose(out_b, ref_b, atol=1e-5, rtol=1e-5)

    # 5) shape whose row count is not a multiple of the block (partial last block)
    xc1 = jax.random.normal(k1, (2, 2, 125, 256), dtype=jnp.float32)
    xc2 = jax.random.normal(k2, (2, 2, 125, 256), dtype=jnp.float32)
    out_c = mixed_op(xc1, xc2, ops_weights, gumbel_training=True, force_pallas=True)
    jax.block_until_ready(out_c)
    ref_c = _reference(xc1, xc2, ops_weights, gumbel_training=True)
    assert jnp.allclose(out_c, ref_c, atol=1e-5, rtol=1e-5)

    # 6) bf16 inputs (in-dtype weight multiply + 16-row sublane packing)
    xh1 = x1.astype(jnp.bfloat16)
    xh2 = x2.astype(jnp.bfloat16)
    out_h = mixed_op(xh1, xh2, ops_weights, gumbel_training=True, force_pallas=True)
    jax.block_until_ready(out_h)
    ref_h = _reference(xh1, xh2, ops_weights, gumbel_training=True)
    assert out_h.dtype == jnp.bfloat16
    assert jnp.allclose(out_h.astype(jnp.float32), ref_h.astype(jnp.float32),
                        atol=2e-2, rtol=2e-2)

    # 7) non-128-divisible element count -> XLA fallback (no padding copies)
    xo1 = jax.random.normal(k1, (3, 5, 7, 11), dtype=jnp.float32)
    xo2 = jax.random.normal(k2, (3, 5, 7, 11), dtype=jnp.float32)
    out_o = mixed_op(xo1, xo2, ops_weights, gumbel_training=True, force_pallas=True)
    jax.block_until_ready(out_o)
    ref_o = _reference(xo1, xo2, ops_weights, gumbel_training=True)
    assert jnp.allclose(out_o, ref_o, atol=1e-5, rtol=1e-5)

    print("KERNEL_OK")
</pallas_src>

<mosaic_0001>
module attributes {stable_mosaic.version = 11 : i64} {
  func.func @_mixed_op_kernel(%arg0: i32, %arg1: memref<2xf32, #tpu.memory_space<smem>>, %arg2: memref<1x2048xf32, #tpu.memory_space<vmem>>, %arg3: memref<1x2048xf32, #tpu.memory_space<vmem>>, %arg4: memref<1x2048xf32, #tpu.memory_space<vmem>>) attributes {dimension_semantics = [#tpu.dimension_semantics<parallel>], iteration_bounds = array<i64: 1>, scalar_prefetch = 1 : i64, scratch_operands = 0 : i64, tpu.core_type = #tpu.core_type<tc>, window_params = [{transform_indices = @transform_0, window_bounds = array<i64: 1, 2048>}, {transform_indices = @transform_1, window_bounds = array<i64: 1, 2048>}, {transform_indices = @transform_2, window_bounds = array<i64: 1, 2048>}]} {
    %c0 = arith.constant 0 : index
    %0 = memref.load %arg1[%c0] : memref<2xf32, #tpu.memory_space<smem>>
    %c1 = arith.constant 1 : index
    %1 = memref.load %arg1[%c1] : memref<2xf32, #tpu.memory_space<smem>>
    %c0_0 = arith.constant 0 : index
    %c0_1 = arith.constant 0 : index
    %2 = vector.load %arg2[%c0_0, %c0_1] : memref<1x2048xf32, #tpu.memory_space<vmem>>, vector<1x2048xf32>
    %c0_2 = arith.constant 0 : index
    %c0_3 = arith.constant 0 : index
    %3 = vector.load %arg3[%c0_2, %c0_3] : memref<1x2048xf32, #tpu.memory_space<vmem>>, vector<1x2048xf32>
    %cst = arith.constant 0.000000e+00 : f32
    %4 = arith.cmpf oeq, %0, %cst : f32
    %5 = arith.extui %4 : i1 to i32
    %c0_i32 = arith.constant 0 : i32
    %6 = arith.cmpi ne, %5, %c0_i32 : i32
    scf.if %6 {
      %16 = arith.addf %2, %3 : vector<1x2048xf32>
      %17 = vector.broadcast %1 : f32 to vector<1x2048xf32>
      %18 = arith.mulf %16, %17 : vector<1x2048xf32>
      %c0_10 = arith.constant 0 : index
      %c0_11 = arith.constant 0 : index
      %19 = vector.load %arg4[%c0_10, %c0_11] : memref<1x2048xf32, #tpu.memory_space<vmem>>, vector<1x2048xf32>
      tpu.vector_store %arg4[%c0_10, %c0_11], %18 {strides = array<i32>} : memref<1x2048xf32, #tpu.memory_space<vmem>>, vector<1x2048xf32>,
    } else {
    }
    %cst_4 = arith.constant 1.000000e+00 : f32
    %7 = arith.cmpf oeq, %0, %cst_4 : f32
    %8 = arith.extui %7 : i1 to i32
    %c0_i32_5 = arith.constant 0 : i32
    %9 = arith.cmpi ne, %8, %c0_i32_5 : i32
    scf.if %9 {
      %16 = arith.mulf %2, %3 : vector<1x2048xf32>
      %17 = vector.broadcast %1 : f32 to vector<1x2048xf32>
      %18 = arith.mulf %16, %17 : vector<1x2048xf32>
      %c0_10 = arith.constant 0 : index
      %c0_11 = arith.constant 0 : index
      %19 = vector.load %arg4[%c0_10, %c0_11] : memref<1x2048xf32, #tpu.memory_space<vmem>>, vector<1x2048xf32>
      tpu.vector_store %arg4[%c0_10, %c0_11], %18 {strides = array<i32>} : memref<1x2048xf32, #tpu.memory_space<vmem>>, vector<1x2048xf32>,
    } else {
    }
    %cst_6 = arith.constant 2.000000e+00 : f32
    %10 = arith.cmpf oeq, %0, %cst_6 : f32
    %11 = arith.extui %10 : i1 to i32
    %c0_i32_7 = arith.constant 0 : i32
    %12 = arith.cmpi ne, %11, %c0_i32_7 : i32
    scf.if %12 {
      %16 = arith.subf %2, %3 : vector<1x2048xf32>
      %17 = math.absf %16 : vector<1x2048xf32>
      %18 = vector.broadcast %1 : f32 to vector<1x2048xf32>
      %19 = arith.mulf %17, %18 : vector<1x2048xf32>
      %c0_10 = arith.constant 0 : index
      %c0_11 = arith.constant 0 : index
      %20 = vector.load %arg4[%c0_10, %c0_11] : memref<1x2048xf32, #tpu.memory_space<vmem>>, vector<1x2048xf32>
      tpu.vector_store %arg4[%c0_10, %c0_11], %19 {strides = array<i32>} : memref<1x2048xf32, #tpu.memory_space<vmem>>, vector<1x2048xf32>,
    } else {
    }
    %cst_8 = arith.constant 3.000000e+00 : f32
    %13 = arith.cmpf oeq, %0, %cst_8 : f32
    %14 = arith.extui %13 : i1 to i32
    %c0_i32_9 = arith.constant 0 : i32
    %15 = arith.cmpi ne, %14, %c0_i32_9 : i32
    scf.if %15 {
      %16 = arith.subf %2, %3 : vector<1x2048xf32>
      %17 = arith.subf %2, %3 : vector<1x2048xf32>
      %18 = arith.mulf %16, %17 : vector<1x2048xf32>
      %19 = vector.broadcast %1 : f32 to vector<1x2048xf32>
      %20 = arith.mulf %18, %19 : vector<1x2048xf32>
      %c0_10 = arith.constant 0 : index
      %c0_11 = arith.constant 0 : index
      %21 = vector.load %arg4[%c0_10, %c0_11] : memref<1x2048xf32, #tpu.memory_space<vmem>>, vector<1x2048xf32>
      tpu.vector_store %arg4[%c0_10, %c0_11], %20 {strides = array<i32>} : memref<1x2048xf32, #tpu.memory_space<vmem>>, vector<1x2048xf32>,
    } else {
    }
    return
  }
  func.func @transform_0(%arg0: i32, %arg1: memref<2xf32, #tpu.memory_space<smem>>) -> (i32, i32) {
    %c0_i32 = arith.constant 0 : i32
    %c0_i32_0 = arith.constant 0 : i32
    return %arg0, %c0_i32 : i32, i32
  }
  func.func @transform_1(%arg0: i32, %arg1: memref<2xf32, #tpu.memory_space<smem>>) -> (i32, i32) {
    %c0_i32 = arith.constant 0 : i32
    %c0_i32_0 = arith.constant 0 : i32
    return %arg0, %c0_i32 : i32, i32
  }
  func.func @transform_2(%arg0: i32, %arg1: memref<2xf32, #tpu.memory_space<smem>>) -> (i32, i32) {
    %c0_i32 = arith.constant 0 : i32
    %c0_i32_0 = arith.constant 0 : i32
    return %arg0, %c0_i32 : i32, i32
  }
}

</mosaic_0001>

<bundles_post_ra>
// kernel: tpu_custom_call.1
= control target key start
LH: loop header
LB: loop body
LE: loop exit
PB: predicated region body
PF: predicated region fallthrough
CT: control target
= control target key end

     0   :  { %s284_s0 = inlined_call_operand.hbm [shape: f32[2], index: 0, kind: input, shape index: {}]   ;;  %s285_s1 = inlined_call_operand.hbm [shape: f32[1,2048], index: 1, kind: input, shape index: {}]   ;;  %s286_s2 = inlined_call_operand.hbm [shape: f32[1,2048], index: 2, kind: input, shape index: {}]   ;;  %s287_s3 = inlined_call_operand.hbm [shape: f32[1,2048], index: 3, kind: output, shape index: {}]  }
   0x1   :  { %s116_s14 = scalar_lea.hbm %s284_s0, 16 }
   0x2   :  { %p117_p0 = scmp.ne.s32.totalorder %s284_s0, %s116_s14  ;;  %p120_p1 = scmp.lt.u32.totalorder %s116_s14, %s284_s0 }
   0x4   :  { %p122_p2 = pnand %p120_p1, %p117_p0 }
   0x6   :  { %125 = shalt.err (!%p122_p2)  }
   0x7   :  { %s200_s19 = smov [#allocation3]  }
   0x8   :  { %9 = dma.hbm_to_smem %s284_s0, 16, %s200_s19, [#allocation2] }
   0x9   :  { %192 = dma.done.wait [#allocation2], 16 }
   0xa   :  { %193 = vsyncadd [#allocation2], 4294967280 }
   0xb   :  { %11 = sfence }
   0xc   :  { %12 = vsyncpa [#allocation5], 0 }
   0xd   :  { %13 = vsyncpa [#allocation8], 0 }
   0xe   :  { %14 = vsyncpa [#allocation6], 0  ;;  %s201_s22 = smov [#allocation4]   ;;  %s202_s24 = smov [#allocation7]  }
   0xf   :  { %s21_s23 = sshll.u32 %s201_s22, 4  ;;  %s31_s25 = sshll.u32 %s202_s24, 4  ;;  %s22_s23 = int_to_ptr.vmem [resolvable:$true] %s21_s23  ;;  %s32_s25 = int_to_ptr.vmem [resolvable:$true] %s31_s25 }
  0x10   :  { %s126_s28 = scalar_lea.hbm %s285_s1, 256 }
  0x11   :  { %p127_p3 = scmp.ne.s32.totalorder %s285_s1, %s126_s28  ;;  %p130_p4 = scmp.lt.u32.totalorder %s126_s28, %s285_s1 }
  0x13   :  { %p132_p5 = pnand %p130_p4, %p127_p3 }
  0x15   :  { %135 = shalt.err (!%p132_p5)
}
  0x16   :  { %s136_s5 = scalar_lea.vmem %s22_s23, 256  ;;  %p141_p7 = scmp.lt.s32.totalorder %s22_s23, %s22_s23 }
  0x17   :  { %p137_p6 = scmp.ne.s32.totalorder %s22_s23, %s136_s5  ;;  %p142_p8 = scmp.lt.s32.totalorder %s136_s5, %s136_s5 }
  0x19   :  { %p143_p9 = por %p142_p8, %p141_p7 }
  0x1b   :  { %p144_p10 = pnand %p143_p9, %p137_p6 }
  0x1d   :  { %147 = shalt.err (!%p144_p10)
}
  0x1e   :  { %24 = dma.hbm_to_vmem [thread:$0]  %s285_s1, 256, %s22_s23, [#allocation5]  }
  0x1f   :  { %s148_s10 = scalar_lea.hbm %s286_s2, 256 }
  0x20   :  { %p149_p11 = scmp.ne.s32.totalorder %s286_s2, %s148_s10  ;;  %p152_p12 = scmp.lt.u32.totalorder %s148_s10, %s286_s2 }
  0x22   :  { %p154_p13 = pnand %p152_p12, %p149_p11 }
  0x24   :  { %157 = shalt.err (!%p154_p13)
}
  0x25   :  { %s158_s15 = scalar_lea.vmem %s32_s25, 256  ;;  %p163_p1 = scmp.lt.s32.totalorder %s32_s25, %s32_s25 }
  0x26   :  { %p159_p0 = scmp.ne.s32.totalorder %s32_s25, %s158_s15  ;;  %p164_p2 = scmp.lt.s32.totalorder %s158_s15, %s158_s15 }
  0x28   :  { %p165_p3 = por %p164_p2, %p163_p1 }
  0x2a   :  { %p166_p4 = pnand %p165_p3, %p159_p0 }
  0x2c   :  { %169 = shalt.err (!%p166_p4)
}
  0x2d   :  { %34 = dma.hbm_to_vmem [thread:$0]  %s286_s2, 256, %s32_s25, [#allocation8]  }
  0x2e   :  { %194 = dma.done.wait [#allocation5], 256  }
  0x2f   :  { %195 = vsyncadd [#allocation5], 4294967040 }
  0x30   :  { %196 = dma.done.wait [#allocation8], 256  }
  0x31   :  { %197 = vsyncadd [#allocation8], 4294967040  ;;  %s260_s17 = sld [smem:[#allocation3]]  ;;  %s262_s18 = sld [smem:[#allocation3 + $0x1]]  ;;  %v43_v0 = vld [vmem:[#allocation4] sm:$0xff]  ;;  %v44_v1 = vld [vmem:[#allocation4 + $0x8] sm:$0xff] }
  0x32   :  { %v45_v2 = vld [vmem:[#allocation7] sm:$0xff]  ;;  %v46_v3 = vld [vmem:[#allocation7 + $0x8] sm:$0xff] }
  0x37   :  { %p47_p5 = scmp.eq.f32.partialorder %s260_s17, 0.0 }
  0x38   :  { %v51_v4 = vadd.f32 (%p47_p5), %v45_v2, %v43_v0  ;;  %v53_v5 = vstv (%p47_p5), %s262_s18  ;;  %v52_v6 = vadd.f32 (%p47_p5), %v46_v3, %v44_v1 }
  0x39   :  { %50 = sbr.rel (!%p47_p5) target bundleno = 64 (0x40), region = 21 }
  0x3a   :  { %v54_v7 = vmul.f32 (%p47_p5), %v53_v5, %v51_v4  ;;  %v55_v8 = vmul.f32 (%p47_p5), %v53_v5, %v52_v6 }
  0x3c   :  { %56 = vst [vmem:[#allocation9] sm:$0xff] (%p47_p5), %v54_v7  ;;  %57 = vst [vmem:[#allocation9 + $0x8] sm:$0xff] (%p47_p5), %v55_v8 }
  0x40 PF:  { %p58_p6 = scmp.eq.f32.partialorder %s260_s17, 1.0 }
  0x41   :  { %v62_v9 = vmul.f32 (%p58_p6), %v45_v2, %v43_v0  ;;  %v64_v10 = vstv (%p58_p6), %s262_s18  ;;  %v63_v11 = vmul.f32 (%p58_p6), %v46_v3, %v44_v1 }
  0x42   :  { %61 = sbr.rel (!%p58_p6) target bundleno = 73 (0x49), region = 25 }
  0x43   :  { %v65_v12 = vmul.f32 (%p58_p6), %v64_v10, %v62_v9  ;;  %v66_v13 = vmul.f32 (%p58_p6), %v64_v10, %v63_v11 }
  0x45   :  { %67 = vst [vmem:[#allocation9] sm:$0xff] (%p58_p6), %v65_v12  ;;  %68 = vst [vmem:[#allocation9 + $0x8] sm:$0xff] (%p58_p6), %v66_v13 }
  0x49 PF:  { %p69_p7 = scmp.eq.f32.partialorder %s260_s17, 2.0 }
  0x4a   :  { %v73_v14 = vsub.f32 (%p69_p7), %v43_v0, %v45_v2  ;;  %v74_v15 = vsub.f32 (%p69_p7), %v44_v1, %v46_v3  ;;  %v77_v16 = vstv (%p69_p7), %s262_s18 }
  0x4b   :  { %72 = sbr.rel (!%p69_p7) target bundleno = 82 (0x52), region = 29 }
  0x4c   :  { %v75_v17 = vand.u32 (%p69_p7), 2147483647, %v73_v14  ;;  %v76_v18 = vand.u32 (%p69_p7), 2147483647, %v74_v15 }
  0x4e   :  { %v78_v19 = vmul.f32 (%p69_p7), %v77_v16, %v75_v17  ;;  %v79_v20 = vmul.f32 (%p69_p7), %v77_v16, %v76_v18 }
  0x50   :  { %80 = vst [vmem:[#allocation9] sm:$0xff] (%p69_p7), %v78_v19  ;;  %81 = vst [vmem:[#allocation9 + $0x8] sm:$0xff] (%p69_p7), %v79_v20 }
  0x52 PF:  { %p82_p8 = scmp.eq.f32.partialorder %s260_s17, 3.0 }
  0x53   :  { %v86_v21 = vsub.f32 (%p82_p8), %v43_v0, %v45_v2  ;;  %v87_v22 = vsub.f32 (%p82_p8), %v44_v1, %v46_v3  ;;  %v90_v23 = vstv (%p82_p8), %s262_s18 }
  0x54   :  { %85 = sbr.rel (!%p82_p8) target bundleno = 91 (0x5b), region = 33 }
  0x55   :  { %v88_v24 = vmul.f32 (%p82_p8), %v86_v21, %v86_v21  ;;  %v89_v25 = vmul.f32 (%p82_p8), %v87_v22, %v87_v22 }
  0x57   :  { %v91_v26 = vmul.f32 (%p82_p8), %v90_v23, %v88_v24  ;;  %v92_v27 = vmul.f32 (%p82_p8), %v90_v23, %v89_v25 }
  0x59   :  { %93 = vst [vmem:[#allocation9] sm:$0xff] (%p82_p8), %v91_v26  ;;  %94 = vst [vmem:[#allocation9 + $0x8] sm:$0xff] (%p82_p8), %v92_v27 }
  0x5b PF:  { %s203_s2 = smov [#allocation9]  }
  0x5c   :  { %s101_s19 = sshll.u32 %s203_s2, 4  ;;  %s102_s19 = int_to_ptr.vmem [resolvable:$true] %s101_s19 }
  0x5d   :  { %s170_s20 = scalar_lea.vmem %s102_s19, 256  ;;  %p175_p10 = scmp.lt.s32.totalorder %s102_s19, %s102_s19 }
  0x5e   :  { %p171_p9 = scmp.ne.s32.totalorder %s102_s19, %s170_s20  ;;  %p176_p11 = scmp.lt.s32.totalorder %s170_s20, %s170_s20 }
  0x60   :  { %p177_p12 = por %p176_p11, %p175_p10 }
  0x62   :  { %p178_p13 = pnand %p177_p12, %p171_p9 }
  0x64   :  { %181 = shalt.err (!%p178_p13)
}
  0x65   :  { %s182_s23 = scalar_lea.hbm %s287_s3, 256 }
  0x66   :  { %p183_p0 = scmp.ne.s32.totalorder %s287_s3, %s182_s23  ;;  %p186_p1 = scmp.lt.u32.totalorder %s182_s23, %s287_s3 }
  0x68   :  { %p188_p2 = pnand %p186_p1, %p183_p0 }
  0x6a   :  { %191 = shalt.err (!%p188_p2)
}
  0x6b   :  { %104 = dma.vmem_to_hbm [thread:$0]  %s102_s19, 256, %s287_s3, [#allocation6]  }
  0x6c   :  { %198 = dma.done.wait [#allocation6], 256  }
  0x6d   :  { %199 = vsyncadd [#allocation6], 4294967040 }
  0x6e   :  { %108 = vsyncpa [#allocation5], 1 }
  0x6f   :  { %109 = vsyncpa [#allocation8], 1 }
  0x70   :  { %110 = vsyncpa [#allocation6], 1 }

</bundles_post_ra>
